<compile_context>
chip_gen: v5e
topology: v5e:2x2
jax: 0.10.0
libtpu: 0.0.40
codegen_flags: <defaults>
</compile_context>

<pallas_src>
import jax
import jax.numpy as jnp
import numpy as np
from jax.experimental import pallas as pl
from jax.experimental.pallas import tpu as pltpu


# ----------------------------- configuration --------------------------------
BATCH = 2
VOCAB = 50
SEQ = 8
EMB = 32                       # embedding_length
OC = 8                         # out_channels
OUT = 4                        # output_size
KERNEL_HEIGHTS = (3, 4, 5)
KH_MAX = max(KERNEL_HEIGHTS)
PAD = KH_MAX - 1               # common symmetric zero padding (4)
T_PAD = SEQ + 2 * PAD          # 16 padded rows per sentence
N_ROWS = BATCH * T_PAD         # 32 rows in the batch-stacked layout
NC = len(KERNEL_HEIGHTS) * OC  # 24 fused conv output channels


# ------------------------------ Pallas kernel --------------------------------
def _cnn_kernel(ids_ref, emb_ref, w_ref, b_ref, mask_ref, wl_ref, bl_ref, out_ref):
    """Single grid step; processes the whole batch.

    ids_ref  : (N_ROWS, 1) int32        padded token-id column, -1 on pad rows
    emb_ref  : (VOCAB, EMB) bf16        embedding table
    w_ref    : (KH_MAX, EMB, NC) bf16   fused per-tap conv weights (branch-major)
    b_ref    : (1, NC) f32              fused conv bias
    mask_ref : (BATCH, N_ROWS, NC) f32  precomputed pooling validity masks
    wl_ref   : (NC, OUT) f32            label weight (rows branch-major)
    bl_ref   : (1, OUT) f32             label bias
    out_ref  : (BATCH, OUT) f32         softmax probabilities
    """
    # 1) embedding lookup as a one-hot matmul on the MXU; pad rows (id == -1)
    #    give all-zero one-hot rows -> zero padding between/around sentences.
    ids = ids_ref[...]                                              # (N_ROWS, 1)
    lane = jax.lax.broadcasted_iota(jnp.int32, (N_ROWS, VOCAB), 1)
    onehot = jnp.where(lane == ids, 1.0, 0.0).astype(jnp.bfloat16)  # (N_ROWS, VOCAB)
    x = jnp.dot(onehot, emb_ref[...],
                preferred_element_type=jnp.float32).astype(jnp.bfloat16)  # (N_ROWS, EMB)

    # 2) fused conv (all three kernel heights, both sentences):
    #    acc[i] = sum_k x[i+k] @ W[k]  via per-tap matmuls + sublane rolls.
    #    Wrap-around rows touched by the roll are invalid and masked in step 3.
    acc = jnp.dot(x, w_ref[0], preferred_element_type=jnp.float32)  # (N_ROWS, NC)
    for k in range(1, KH_MAX):
        yk = jnp.dot(x, w_ref[k], preferred_element_type=jnp.float32)
        acc = acc + pltpu.roll(yk, shift=N_ROWS - k, axis=0)        # == shift by -k
    acts = jnp.maximum(acc + b_ref[...], 0.0)                       # (N_ROWS, NC)

    # 3) masked max-pool per (batch, branch).  Masks are compile-time constants
    #    passed in; zeroing invalid rows is exact since valid ReLU'd values >= 0.
    feats = [jnp.max(acts * mask_ref[b], axis=0, keepdims=True)
             for b in range(BATCH)]
    feat = jnp.concatenate(feats, axis=0)                           # (BATCH, NC)

    # TODO(synk): nn.Dropout is identity at inference; training-mode dropout not implemented.

    # 4) linear + softmax
    logits = jnp.dot(feat, wl_ref[...],
                     preferred_element_type=jnp.float32) + bl_ref[...]
    z = logits - jnp.max(logits, axis=1, keepdims=True)
    e = jnp.exp(z)
    inv = pl.reciprocal(jnp.sum(e, axis=1, keepdims=True), approx=True)
    out_ref[...] = e * inv


# ------------------------------ weight prep (numpy, outside jit) --------------
def prepare_params(embedding, conv_ws, conv_bs, label_w, label_b):
    """Build the fused per-tap conv weight/bias, the pooling masks and the
    permuted label weight once, in numpy, so no per-call XLA glue ops surround
    the pallas_call."""
    emb2 = np.asarray(embedding, np.float32)                     # (VOCAB, EMB)

    # Per-tap fused conv weights, branch-major channels, zero-padded taps so
    # every branch is aligned on the common PAD = KH_MAX-1 padding.
    w3 = np.zeros((KH_MAX, EMB, NC), np.float32)
    b_all = np.zeros((1, NC), np.float32)
    for j, kh in enumerate(KERNEL_HEIGHTS):
        off = KH_MAX - kh
        wj = np.asarray(conv_ws[j], np.float32)                  # (kh, EMB, OC)
        for k in range(kh):
            w3[k + off, :, j * OC:(j + 1) * OC] = wj[k]
        b_all[0, j * OC:(j + 1) * OC] = np.asarray(conv_bs[j], np.float32)

    # Pooling validity masks: row i is valid for batch b / branch j iff
    # 0 <= i - b*T_PAD < SEQ + kh_j - 1 (the branch's conv output length).
    mask = np.zeros((BATCH, N_ROWS, NC), np.float32)
    for b in range(BATCH):
        for j, kh in enumerate(KERNEL_HEIGHTS):
            n_out = SEQ + kh - 1
            mask[b, b * T_PAD:b * T_PAD + n_out, j * OC:(j + 1) * OC] = 1.0

    # PyTorch flattens (B, OC, 3) as index oc*3 + j; the kernel's feature order
    # is branch-major j*OC + oc.  Permute label_w accordingly (compile time).
    wl = (np.asarray(label_w, np.float32)
          .reshape(OUT, OC, len(KERNEL_HEIGHTS))
          .transpose(2, 1, 0)
          .reshape(NC, OUT))
    bl = np.asarray(label_b, np.float32).reshape(1, OUT)

    return (jnp.asarray(emb2, jnp.bfloat16), jnp.asarray(w3, jnp.bfloat16),
            jnp.asarray(b_all), jnp.asarray(mask),
            jnp.asarray(wl), jnp.asarray(bl))


# ------------------------------ wrapper ---------------------------------------
@jax.jit
def cnn_forward(token_ids, emb_bf, w3, b_all, mask, wl, bl):
    # Tiny pad of (BATCH, SEQ) ids into the batch-stacked (N_ROWS, 1) column;
    # pad rows get id -1 so their one-hot row (and hence embedding row) is zero.
    ids_col = jnp.pad(token_ids.astype(jnp.int32), ((0, 0), (PAD, PAD)),
                      constant_values=-1).reshape(N_ROWS, 1)
    return pl.pallas_call(
        _cnn_kernel,
        out_shape=jax.ShapeDtypeStruct((BATCH, OUT), jnp.float32),
        grid=(1,),
        in_specs=[
            pl.BlockSpec((N_ROWS, 1), lambda i: (0, 0)),
            pl.BlockSpec((VOCAB, EMB), lambda i: (0, 0)),
            pl.BlockSpec((KH_MAX, EMB, NC), lambda i: (0, 0, 0)),
            pl.BlockSpec((1, NC), lambda i: (0, 0)),
            pl.BlockSpec((BATCH, N_ROWS, NC), lambda i: (0, 0, 0)),
            pl.BlockSpec((NC, OUT), lambda i: (0, 0)),
            pl.BlockSpec((1, OUT), lambda i: (0, 0)),
        ],
        out_specs=pl.BlockSpec((BATCH, OUT), lambda i: (0, 0)),
        compiler_params=pltpu.CompilerParams(
            dimension_semantics=("arbitrary",)),
    )(ids_col, emb_bf, w3, b_all, mask, wl, bl)


# ------------------------------ pure-JAX reference ---------------------------
def reference_forward(token_ids, embedding, conv_ws, conv_bs, label_w, label_b):
    emb = embedding[token_ids]                                  # (B, S, E)
    per_conv = []
    for j, kh in enumerate(KERNEL_HEIGHTS):
        xp = jnp.pad(emb, ((0, 0), (kh - 1, kh - 1), (0, 0)))
        t_out = SEQ + kh - 1
        acc = jnp.zeros((BATCH, t_out, OC), jnp.float32)
        for k in range(kh):
            acc = acc + jnp.einsum('bte,eo->bto', xp[:, k:k + t_out, :],
                                   conv_ws[j][k])
        acc = acc + conv_bs[j].reshape(1, 1, OC)
        act = jnp.maximum(acc, 0.0)
        per_conv.append(jnp.max(act, axis=1))                   # (B, OC)
    all_out = jnp.stack(per_conv, axis=-1)                      # (B, OC, 3)
    flat = all_out.reshape(BATCH, -1)                           # oc*3 + j order
    logits = flat @ label_w.T + label_b
    return jax.nn.softmax(logits, axis=1)


# ------------------------------ main ------------------------------------------
if __name__ == "__main__":
    key = jax.random.PRNGKey(0)
    keys = jax.random.split(key, 10)

    # deterministic synthetic parameters (shapes follow the PyTorch module)
    embedding = jax.random.normal(keys[0], (VOCAB, EMB), jnp.float32) * 0.1
    conv_ws, conv_bs = [], []
    for j, kh in enumerate(KERNEL_HEIGHTS):
        # PyTorch conv weight is (OC, 1, kh, EMB); stored here as (kh, EMB, OC)
        w = jax.random.normal(keys[1 + j], (kh, EMB, OC), jnp.float32) * 0.1
        b = jax.random.normal(keys[4 + j], (OC,), jnp.float32) * 0.1
        conv_ws.append(w)
        conv_bs.append(b)
    label_w = jax.random.normal(keys[7], (OUT, NC), jnp.float32) * 0.1
    label_b = jax.random.normal(keys[8], (OUT,), jnp.float32) * 0.1

    token_ids = jax.random.randint(keys[9], (BATCH, SEQ), 0, VOCAB, jnp.int32)

    emb_bf, w3, b_all, mask, wl, bl = prepare_params(
        embedding, conv_ws, conv_bs, label_w, label_b)

    probs = cnn_forward(token_ids, emb_bf, w3, b_all, mask, wl, bl)
    probs = jax.block_until_ready(probs)

    ref = reference_forward(token_ids, embedding, conv_ws, conv_bs,
                            label_w, label_b)
    np.testing.assert_allclose(np.asarray(probs), np.asarray(ref),
                               rtol=2e-2, atol=2e-2)
    assert probs.shape == (BATCH, OUT)

    print("KERNEL_OK")
</pallas_src>

<mosaic_0001>
module attributes {stable_mosaic.version = 11 : i64} {
  func.func @_cnn_kernel(%arg0: i32, %arg1: memref<32x1xi32, #tpu.memory_space<vmem>>, %arg2: memref<50x32xbf16, #tpu.memory_space<vmem>>, %arg3: memref<5x32x24xbf16, #tpu.memory_space<vmem>>, %arg4: memref<1x24xf32, #tpu.memory_space<vmem>>, %arg5: memref<2x32x24xf32, #tpu.memory_space<vmem>>, %arg6: memref<24x4xf32, #tpu.memory_space<vmem>>, %arg7: memref<1x4xf32, #tpu.memory_space<vmem>>, %arg8: memref<2x4xf32, #tpu.memory_space<vmem>>) attributes {dimension_semantics = [#tpu.dimension_semantics<arbitrary>], iteration_bounds = array<i64: 1>, scalar_prefetch = 0 : i64, scratch_operands = 0 : i64, tpu.core_type = #tpu.core_type<tc>, window_params = [{pipeline_mode = #tpu.pipeline_mode<synchronous>, transform_indices = @transform_0, window_bounds = array<i64: 32, 1>}, {pipeline_mode = #tpu.pipeline_mode<synchronous>, transform_indices = @transform_1, window_bounds = array<i64: 50, 32>}, {pipeline_mode = #tpu.pipeline_mode<synchronous>, transform_indices = @transform_2, window_bounds = array<i64: 5, 32, 24>}, {pipeline_mode = #tpu.pipeline_mode<synchronous>, transform_indices = @transform_3, window_bounds = array<i64: 1, 24>}, {pipeline_mode = #tpu.pipeline_mode<synchronous>, transform_indices = @transform_4, window_bounds = array<i64: 2, 32, 24>}, {pipeline_mode = #tpu.pipeline_mode<synchronous>, transform_indices = @transform_5, window_bounds = array<i64: 24, 4>}, {pipeline_mode = #tpu.pipeline_mode<synchronous>, transform_indices = @transform_6, window_bounds = array<i64: 1, 4>}, {pipeline_mode = #tpu.pipeline_mode<synchronous>, transform_indices = @transform_7, window_bounds = array<i64: 2, 4>}]} {
    %c0 = arith.constant 0 : index
    %c0_0 = arith.constant 0 : index
    %0 = vector.load %arg1[%c0, %c0_0] : memref<32x1xi32, #tpu.memory_space<vmem>>, vector<32x1xi32>
    %1 = tpu.iota {dimensions = array<i32: 1>} : vector<32x50xi32>
    %2 = vector.broadcast %0 : vector<32x1xi32> to vector<32x50xi32>
    %3 = arith.cmpi eq, %1, %2 : vector<32x50xi32>
    %cst = arith.constant 1.000000e+00 : f32
    %cst_1 = arith.constant 0.000000e+00 : f32
    %4 = vector.broadcast %cst : f32 to vector<32x50xf32>
    %5 = vector.broadcast %cst_1 : f32 to vector<32x50xf32>
    %6 = arith.select %3, %4, %5 : vector<32x50xi1>, vector<32x50xf32>
    %7 = arith.truncf %6 : vector<32x50xf32> to vector<32x50xbf16>
    %c0_2 = arith.constant 0 : index
    %c0_3 = arith.constant 0 : index
    %8 = vector.load %arg2[%c0_2, %c0_3] : memref<50x32xbf16, #tpu.memory_space<vmem>>, vector<50x32xbf16>
    %cst_4 = arith.constant dense<0.000000e+00> : vector<32x32xf32>
    %9 = tpu.matmul %7, %8, %cst_4 {dimension_numbers = #tpu.dot_dimension_numbers<[1], [0], [0], [1], [0, 0, 1, 1], [], []>} : vector<32x50xbf16>, vector<50x32xbf16>, vector<32x32xf32> -> vector<32x32xf32>
    %10 = arith.truncf %9 : vector<32x32xf32> to vector<32x32xbf16>
    %c0_5 = arith.constant 0 : index
    %c0_6 = arith.constant 0 : index
    %c0_7 = arith.constant 0 : index
    %11 = vector.load %arg3[%c0_5, %c0_6, %c0_7] : memref<5x32x24xbf16, #tpu.memory_space<vmem>>, vector<1x32x24xbf16>
    %12 = vector.shape_cast %11 : vector<1x32x24xbf16> to vector<32x24xbf16>
    %cst_8 = arith.constant dense<0.000000e+00> : vector<32x24xf32>
    %13 = tpu.matmul %10, %12, %cst_8 {dimension_numbers = #tpu.dot_dimension_numbers<[1], [0], [0], [1], [0, 0, 1, 1], [], []>} : vector<32x32xbf16>, vector<32x24xbf16>, vector<32x24xf32> -> vector<32x24xf32>
    %c1 = arith.constant 1 : index
    %c0_9 = arith.constant 0 : index
    %c0_10 = arith.constant 0 : index
    %14 = vector.load %arg3[%c1, %c0_9, %c0_10] : memref<5x32x24xbf16, #tpu.memory_space<vmem>>, vector<1x32x24xbf16>
    %15 = vector.shape_cast %14 : vector<1x32x24xbf16> to vector<32x24xbf16>
    %cst_11 = arith.constant dense<0.000000e+00> : vector<32x24xf32>
    %16 = tpu.matmul %10, %15, %cst_11 {dimension_numbers = #tpu.dot_dimension_numbers<[1], [0], [0], [1], [0, 0, 1, 1], [], []>} : vector<32x32xbf16>, vector<32x24xbf16>, vector<32x24xf32> -> vector<32x24xf32>
    %c31_i32 = arith.constant 31 : i32
    %17 = tpu.dynamic_rotate %16 by %c31_i32 dim 0 : vector<32x24xf32>, i32 -> vector<32x24xf32>
    %18 = arith.addf %13, %17 : vector<32x24xf32>
    %c2 = arith.constant 2 : index
    %c0_12 = arith.constant 0 : index
    %c0_13 = arith.constant 0 : index
    %19 = vector.load %arg3[%c2, %c0_12, %c0_13] : memref<5x32x24xbf16, #tpu.memory_space<vmem>>, vector<1x32x24xbf16>
    %20 = vector.shape_cast %19 : vector<1x32x24xbf16> to vector<32x24xbf16>
    %cst_14 = arith.constant dense<0.000000e+00> : vector<32x24xf32>
    %21 = tpu.matmul %10, %20, %cst_14 {dimension_numbers = #tpu.dot_dimension_numbers<[1], [0], [0], [1], [0, 0, 1, 1], [], []>} : vector<32x32xbf16>, vector<32x24xbf16>, vector<32x24xf32> -> vector<32x24xf32>
    %c30_i32 = arith.constant 30 : i32
    %22 = tpu.dynamic_rotate %21 by %c30_i32 dim 0 : vector<32x24xf32>, i32 -> vector<32x24xf32>
    %23 = arith.addf %18, %22 : vector<32x24xf32>
    %c3 = arith.constant 3 : index
    %c0_15 = arith.constant 0 : index
    %c0_16 = arith.constant 0 : index
    %24 = vector.load %arg3[%c3, %c0_15, %c0_16] : memref<5x32x24xbf16, #tpu.memory_space<vmem>>, vector<1x32x24xbf16>
    %25 = vector.shape_cast %24 : vector<1x32x24xbf16> to vector<32x24xbf16>
    %cst_17 = arith.constant dense<0.000000e+00> : vector<32x24xf32>
    %26 = tpu.matmul %10, %25, %cst_17 {dimension_numbers = #tpu.dot_dimension_numbers<[1], [0], [0], [1], [0, 0, 1, 1], [], []>} : vector<32x32xbf16>, vector<32x24xbf16>, vector<32x24xf32> -> vector<32x24xf32>
    %c29_i32 = arith.constant 29 : i32
    %27 = tpu.dynamic_rotate %26 by %c29_i32 dim 0 : vector<32x24xf32>, i32 -> vector<32x24xf32>
    %28 = arith.addf %23, %27 : vector<32x24xf32>
    %c4 = arith.constant 4 : index
    %c0_18 = arith.constant 0 : index
    %c0_19 = arith.constant 0 : index
    %29 = vector.load %arg3[%c4, %c0_18, %c0_19] : memref<5x32x24xbf16, #tpu.memory_space<vmem>>, vector<1x32x24xbf16>
    %30 = vector.shape_cast %29 : vector<1x32x24xbf16> to vector<32x24xbf16>
    %cst_20 = arith.constant dense<0.000000e+00> : vector<32x24xf32>
    %31 = tpu.matmul %10, %30, %cst_20 {dimension_numbers = #tpu.dot_dimension_numbers<[1], [0], [0], [1], [0, 0, 1, 1], [], []>} : vector<32x32xbf16>, vector<32x24xbf16>, vector<32x24xf32> -> vector<32x24xf32>
    %c28_i32 = arith.constant 28 : i32
    %32 = tpu.dynamic_rotate %31 by %c28_i32 dim 0 : vector<32x24xf32>, i32 -> vector<32x24xf32>
    %33 = arith.addf %28, %32 : vector<32x24xf32>
    %c0_21 = arith.constant 0 : index
    %c0_22 = arith.constant 0 : index
    %34 = vector.load %arg4[%c0_21, %c0_22] : memref<1x24xf32, #tpu.memory_space<vmem>>, vector<1x24xf32>
    %35 = vector.broadcast %34 : vector<1x24xf32> to vector<32x24xf32>
    %36 = arith.addf %33, %35 : vector<32x24xf32>
    %cst_23 = arith.constant 0.000000e+00 : f32
    %37 = vector.broadcast %cst_23 : f32 to vector<32x24xf32>
    %38 = arith.maximumf %36, %37 : vector<32x24xf32>
    %c0_24 = arith.constant 0 : index
    %c0_25 = arith.constant 0 : index
    %c0_26 = arith.constant 0 : index
    %39 = vector.load %arg5[%c0_24, %c0_25, %c0_26] : memref<2x32x24xf32, #tpu.memory_space<vmem>>, vector<1x32x24xf32>
    %40 = vector.shape_cast %39 : vector<1x32x24xf32> to vector<32x24xf32>
    %41 = arith.mulf %38, %40 : vector<32x24xf32>
    %cst_27 = arith.constant dense<0xFF800000> : vector<24xf32>
    %42 = vector.multi_reduction <maximumf>, %41, %cst_27 [0] : vector<32x24xf32> to vector<24xf32>
    %43 = vector.shape_cast %42 : vector<24xf32> to vector<1x24xf32>
    %c1_28 = arith.constant 1 : index
    %c0_29 = arith.constant 0 : index
    %c0_30 = arith.constant 0 : index
    %44 = vector.load %arg5[%c1_28, %c0_29, %c0_30] : memref<2x32x24xf32, #tpu.memory_space<vmem>>, vector<1x32x24xf32>
    %45 = vector.shape_cast %44 : vector<1x32x24xf32> to vector<32x24xf32>
    %46 = arith.mulf %38, %45 : vector<32x24xf32>
    %cst_31 = arith.constant dense<0xFF800000> : vector<24xf32>
    %47 = vector.multi_reduction <maximumf>, %46, %cst_31 [0] : vector<32x24xf32> to vector<24xf32>
    %48 = vector.shape_cast %47 : vector<24xf32> to vector<1x24xf32>
    %49 = tpu.concatenate %43, %48 in 0 : vector<1x24xf32>, vector<1x24xf32> -> vector<2x24xf32>
    %c0_32 = arith.constant 0 : index
    %c0_33 = arith.constant 0 : index
    %50 = vector.load %arg6[%c0_32, %c0_33] : memref<24x4xf32, #tpu.memory_space<vmem>>, vector<24x4xf32>
    %cst_34 = arith.constant dense<0.000000e+00> : vector<2x4xf32>
    %51 = tpu.matmul %49, %50, %cst_34 {dimension_numbers = #tpu.dot_dimension_numbers<[1], [0], [0], [1], [0, 0, 1, 1], [], []>} : vector<2x24xf32>, vector<24x4xf32>, vector<2x4xf32> -> vector<2x4xf32>
    %c0_35 = arith.constant 0 : index
    %c0_36 = arith.constant 0 : index
    %52 = vector.load %arg7[%c0_35, %c0_36] : memref<1x4xf32, #tpu.memory_space<vmem>>, vector<1x4xf32>
    %53 = vector.broadcast %52 : vector<1x4xf32> to vector<2x4xf32>
    %54 = arith.addf %51, %53 : vector<2x4xf32>
    %cst_37 = arith.constant dense<0xFF800000> : vector<2xf32>
    %55 = vector.multi_reduction <maximumf>, %54, %cst_37 [1] : vector<2x4xf32> to vector<2xf32>
    %56 = vector.shape_cast %55 : vector<2xf32> to vector<2x1xf32>
    %57 = vector.broadcast %56 : vector<2x1xf32> to vector<2x4xf32>
    %58 = arith.subf %54, %57 : vector<2x4xf32>
    %59 = math.exp %58 : vector<2x4xf32>
    %cst_38 = arith.constant dense<0.000000e+00> : vector<2xf32>
    %60 = vector.multi_reduction <add>, %59, %cst_38 [1] : vector<2x4xf32> to vector<2xf32>
    %61 = vector.shape_cast %60 : vector<2xf32> to vector<2x1xf32>
    %62 = tpu.reciprocal %61 {approx = true} : vector<2x1xf32> -> vector<2x1xf32>
    %63 = vector.broadcast %62 : vector<2x1xf32> to vector<2x4xf32>
    %64 = arith.mulf %59, %63 : vector<2x4xf32>
    %c0_39 = arith.constant 0 : index
    %c0_40 = arith.constant 0 : index
    %65 = vector.load %arg8[%c0_39, %c0_40] : memref<2x4xf32, #tpu.memory_space<vmem>>, vector<2x4xf32>
    tpu.vector_store %arg8[%c0_39, %c0_40], %64 {strides = array<i32>} : memref<2x4xf32, #tpu.memory_space<vmem>>, vector<2x4xf32>,
    return
  }
  func.func @transform_0(%arg0: i32) -> (i32, i32) {
    %c0_i32 = arith.constant 0 : i32
    %c0_i32_0 = arith.constant 0 : i32
    %c0_i32_1 = arith.constant 0 : i32
    return %c0_i32, %c0_i32_0 : i32, i32
  }
  func.func @transform_1(%arg0: i32) -> (i32, i32) {
    %c0_i32 = arith.constant 0 : i32
    %c0_i32_0 = arith.constant 0 : i32
    %c0_i32_1 = arith.constant 0 : i32
    return %c0_i32, %c0_i32_0 : i32, i32
  }
  func.func @transform_2(%arg0: i32) -> (i32, i32, i32) {
    %c0_i32 = arith.constant 0 : i32
    %c0_i32_0 = arith.constant 0 : i32
    %c0_i32_1 = arith.constant 0 : i32
    %c0_i32_2 = arith.constant 0 : i32
    return %c0_i32, %c0_i32_0, %c0_i32_1 : i32, i32, i32
  }
  func.func @transform_3(%arg0: i32) -> (i32, i32) {
    %c0_i32 = arith.constant 0 : i32
    %c0_i32_0 = arith.constant 0 : i32
    %c0_i32_1 = arith.constant 0 : i32
    return %c0_i32, %c0_i32_0 : i32, i32
  }
  func.func @transform_4(%arg0: i32) -> (i32, i32, i32) {
    %c0_i32 = arith.constant 0 : i32
    %c0_i32_0 = arith.constant 0 : i32
    %c0_i32_1 = arith.constant 0 : i32
    %c0_i32_2 = arith.constant 0 : i32
    return %c0_i32, %c0_i32_0, %c0_i32_1 : i32, i32, i32
  }
  func.func @transform_5(%arg0: i32) -> (i32, i32) {
    %c0_i32 = arith.constant 0 : i32
    %c0_i32_0 = arith.constant 0 : i32
    %c0_i32_1 = arith.constant 0 : i32
    return %c0_i32, %c0_i32_0 : i32, i32
  }
  func.func @transform_6(%arg0: i32) -> (i32, i32) {
    %c0_i32 = arith.constant 0 : i32
    %c0_i32_0 = arith.constant 0 : i32
    %c0_i32_1 = arith.constant 0 : i32
    return %c0_i32, %c0_i32_0 : i32, i32
  }
  func.func @transform_7(%arg0: i32) -> (i32, i32) {
    %c0_i32 = arith.constant 0 : i32
    %c0_i32_0 = arith.constant 0 : i32
    %c0_i32_1 = arith.constant 0 : i32
    return %c0_i32, %c0_i32_0 : i32, i32
  }
}

</mosaic_0001>

<bundles_post_ra>
// kernel: cnn_forward.1
= control target key start
LH: loop header
LB: loop body
LE: loop exit
PB: predicated region body
PF: predicated region fallthrough
CT: control target
= control target key end

     0   :  { %v607_v2 = vmov 0   ;;  %s809_s0 = inlined_call_operand.vmem [shape: s32[32,1], index: 0, kind: input, shape index: {}]   ;;  %s810_s1 = inlined_call_operand.vmem [shape: bf16[50,32], index: 1, kind: input, shape index: {}]   ;;  %s811_s2 = inlined_call_operand.vmem [shape: bf16[5,32,24], index: 2, kind: input, shape index: {}]   ;;  %s812_s3 = inlined_call_operand.vmem [shape: f32[1,24], index: 3, kind: input, shape index: {}]   ;;  %s813_s4 = inlined_call_operand.vmem [shape: f32[2,32,24], index: 4, kind: input, shape index: {}]   ;;  %s814_s5 = inlined_call_operand.vmem [shape: f32[24,4], index: 5, kind: input, shape index: {}]   ;;  %s815_s6 = inlined_call_operand.vmem [shape: f32[1,4], index: 6, kind: input, shape index: {}]   ;;  %s816_s7 = inlined_call_operand.hbm [shape: f32[2,4], index: 7, kind: output, shape index: {}]  }
   0x1   :  { %v28_v0 = vld [vmem:[%s809_s0] sm:$0xff]  ;;  %v30_v1 = vld [vmem:[%s809_s0 + $0x10] sm:$0xff]  ;;  %573 = vset.pattern.permute.xlu0 %v607_v2  ;;  %574 = vset.pattern.permute.xlu1 %v607_v2  ;;  %v62_v3 = vld [vmem:[%s810_s1 + $0x18] sm:$0x1] }
   0x2   :  { %35 = vperm.xlu0 %573, %v28_v0   ;;  %41 = vperm.xlu1 %574, %v30_v1   ;;  %v76_v4 = vunpack.c.l.b16 %v62_v3 }
   0x3   :  { %12 = vsyncpa [#allocation3], 0  ;;  %vm91_vm0 = vcmask 1040384   ;;  %v29_v7 = vld [vmem:[%s809_s0 + $0x8] sm:$0xff]  ;;  %v31_v8 = vld [vmem:[%s809_s0 + $0x18] sm:$0xff]  ;;  %v32_v12 = vlaneseq  ;;  %v608_v17 = vmov 0.0  }
   0x4   :  { %v80_v5 = vpack.c.b16 %v76_v4, %v76_v4  ;;  %v555_v9 = vld [vmem:[%s810_s1 + $0x10] sm:$0xff]  ;;  %v554_v10 = vld [vmem:[%s810_s1 + $0x8] sm:$0xff]  ;;  %v553_v11 = vld [vmem:[%s810_s1] sm:$0xff]  ;;  %vm84_vm3 = vcmask 408576   ;;  %vm137_vm6 = vcmask 261120   ;;  %vm372_vm11 = vcmask 195584  }
   0x5   :  { %v33_v14 = vand.u32 127, %v32_v12  ;;  %v559_v25 = vld [vmem:[%s811_s2 + $0x18] sm:$0xff]  ;;  %v557_v26 = vld [vmem:[%s811_s2 + $0x8] sm:$0xff]  ;;  %v558_v27 = vld [vmem:[%s811_s2 + $0x10] sm:$0xff]  ;;  %v713_v52 = vshrl.u32 %v32_v12, 7  ;;  %vm439_vm12 = vcmask 25600  }
   0x6   :  { %v93_v6 = vsel %vm91_vm0, %v80_v5, 0  ;;  %192 = vmatpush.bf16.msra.mxu2 %v557_v26  ;;  %566 = vmatpush.bf16.msra.mxu1 %v559_v25  ;;  %v556_v28 = vld [vmem:[%s811_s2] sm:$0xff]  ;;  %v565_v29 = vld [vmem:[%s811_s2 + $0x48] sm:$0xff]  ;;  %v563_v32 = vld [vmem:[%s811_s2 + $0x38] sm:$0xff]  ;;  %s609_s9 = smov [#allocation2]  }
   0x7   :  { %99 = vmatpush.bf16.msra.mxu0 %v93_v6  ;;  %568 = vmatpush.bf16.msra.mxu3 %v557_v26  ;;  %v564_v30 = vld [vmem:[%s811_s2 + $0x40] sm:$0xff]  ;;  %v561_v31 = vld [vmem:[%s811_s2 + $0x28] sm:$0xff]  ;;  %v562_v34 = vld [vmem:[%s811_s2 + $0x30] sm:$0xff]  ;;  %vm169_vm7 = vcmp.lt.s32.totalorder %v713_v52, 7  ;;  %vm245_vm8 = vcmp.lt.s32.totalorder %v713_v52, 6  ;;  %vm294_vm9 = vcmp.lt.s32.totalorder %v713_v52, 5 }
   0x8   :  { %v560_v33 = vld [vmem:[%s811_s2 + $0x20] sm:$0xff]  ;;  %v411_v59 = vld [vmem:[%s814_s5 + $0x10] sm:$0xff]  ;;  %v410_v60 = vld [vmem:[%s814_s5 + $0x8] sm:$0xff]  ;;  %vm343_vm10 = vcmp.lt.s32.totalorder %v713_v52, 4  ;;  %s457_s10 = sshll.u32 %s609_s9, 4  ;;  %s459_s2 = sshll.u32 %s816_s7, 4  ;;  %s458_s10 = int_to_ptr.vmem [resolvable:$true] %s457_s10  ;;  %s460_s2 = int_to_ptr.hbm [resolvable:$true] %s459_s2 }
   0x9   :  { %v409_v0 = vld [vmem:[%s814_s5] sm:$0xff] }
   0xa   :  { %38 = vperm.xlu0 %573, %v29_v7   ;;  %44 = vperm.xlu1 %574, %v31_v8  }
   0xb   :  { %100 = vmatpush.bf16.msra.mxu0 %v555_v9  ;;  %193 = vmatpush.bf16.msra.mxu2 %v556_v28 }
   0xc   :  { %567 = vmatpush.bf16.msra.mxu1 %v558_v27  ;;  %569 = vmatpush.bf16.msra.mxu3 %v556_v28  ;;  %v575_v28 = vld [vmem:[%s812_s3] ss:$0 sm:$0xff] }
   0xf   :  { %101 = vmatpush.bf16.msra.mxu0 %v554_v10  ;;  %326 = vmatpush.bf16.msrb.mxu2 %v565_v29 }
  0x10   :  { %228 = vmatpush.bf16.msrb.mxu3 %v561_v31  ;;  %277 = vmatpush.bf16.msrb.mxu1 %v563_v32 }
  0x13   :  { %102 = vmatpush.bf16.msra.mxu0 %v553_v11  ;;  %327 = vmatpush.bf16.msrb.mxu2 %v564_v30 }
  0x14   :  { %229 = vmatpush.bf16.msrb.mxu3 %v560_v33  ;;  %278 = vmatpush.bf16.msrb.mxu1 %v562_v34 }
  0x17   :  { %150 = vmatpush.bf16.msrb.mxu0 %v559_v25 }
  0x1b   :  { %151 = vmatpush.bf16.msrb.mxu0 %v558_v27 }
  0x74   :  { %v36_v13 = vpop.permute.xlu0 %35  ;;  %v42_v15 = vpop.permute.xlu1 %41 }
  0x75   :  { %vm46_vm1 = vcmp.eq.s32.totalorder %v33_v14, %v36_v13  ;;  %vm48_vm4 = vcmp.eq.s32.totalorder %v33_v14, %v42_v15 }
  0x76   :  { %v50_v18 = vsel %vm46_vm1, 1.0, %v608_v17  ;;  %v52_v22 = vsel %vm48_vm4, 1.0, %v608_v17 }
  0x7c   :  { %v39_v16 = vpop.permute.xlu0 %38  ;;  %v45_v21 = vpop.permute.xlu1 %44 }
  0x7d   :  { %vm47_vm2 = vcmp.eq.s32.totalorder %v33_v14, %v39_v16  ;;  %vm49_vm5 = vcmp.eq.s32.totalorder %v33_v14, %v45_v21 }
  0x7e   :  { %v51_v19 = vsel %vm47_vm2, 1.0, %v608_v17  ;;  %v53_v23 = vsel %vm49_vm5, 1.0, %v608_v17 }
  0x7f   :  { %v54_v20 = vpack.c.bf16 %v51_v19, %v50_v18  ;;  %v55_v24 = vpack.c.bf16 %v53_v23, %v52_v22 }
  0x81   :  { %480 = vmatmul.msk.bf16.vlgmr.msra.gmra.mxu0 %vm84_vm3, %v54_v20 }
  0x91   :  { %481 = vmatmul.msk.bf16.gmra.mxu0 %vm84_vm3, %v55_v24 }
  0xfe   :  { %v104_v35 = vpop.f32.mrf.mxu0 }
 0x106   :  { %v106_v36 = vpop.f32.mrf.mxu0 }
 0x107   :  { %v114_v37 = vpack.c.bf16 %v106_v36, %v104_v35 }
 0x109   :  { %494 = vmatmul.msk.bf16.vlgmr.msrb.gmra.mxu0 %vm137_vm6, %v114_v37  ;;  %504 = vmatmul.msk.bf16.vlgmr.msra.gmra.mxu2 %vm137_vm6, %v114_v37 }
 0x10e   :  { %v109_v38 = vpop.f32.mrf.mxu0 }
 0x116   :  { %v111_v39 = vpop.f32.mrf.mxu0 }
 0x117   :  { %v115_v40 = vpack.c.bf16 %v111_v39, %v109_v38 }
 0x119   :  { %495 = vmatmul.msk.bf16.vlgmr.msra.gmra.mxu1 %vm137_vm6, %v115_v40  ;;  %505 = vmatmul.msk.bf16.vlgmr.msra.gmra.mxu3 %vm137_vm6, %v115_v40 }
 0x11a   :  { %546 = vmatmul.msk.bf16.vlgmr.msrb.gmra.mxu2 %vm137_vm6, %v114_v37  ;;  %432 = vmatpush.msra.mxu3 %v411_v59 }
 0x11c   :  { %433 = vmatpush.msra.mxu3 %v410_v60 }
 0x11e   :  { %434 = vmatpush.msra.mxu3 %v409_v0 }
 0x129   :  { %518 = vmatmul.msk.bf16.vlgmr.msrb.gmra.mxu3 %vm137_vm6, %v114_v37  ;;  %532 = vmatmul.msk.bf16.vlgmr.msrb.gmra.mxu1 %vm137_vm6, %v114_v37 }
 0x12a   :  { %547 = vmatmul.msk.bf16.gmra.mxu2 %vm137_vm6, %v115_v40 }
 0x139   :  { %519 = vmatmul.msk.bf16.gmra.mxu3 %vm137_vm6, %v115_v40  ;;  %533 = vmatmul.msk.bf16.gmra.mxu1 %vm137_vm6, %v115_v40 }
 0x186   :  { %v153_v47 = vpop.f32.mrf.mxu0 }
 0x187   :  { %v163_v56 = vrot.slane %v153_v47, 1 }
 0x18c   :  { %v195_v41 = vpop.f32.mrf.mxu2 }
 0x18e   :  { %v155_v53 = vpop.f32.mrf.mxu0 }
 0x18f   :  { %v164_v55 = vrot.slane %v155_v53, 1 }
 0x191   :  { %v172_v61 = vsel %vm169_vm7, %v163_v56, %v164_v55 }
 0x192   :  { %v196_v3 = vadd.f32 %v195_v41, %v172_v61 }
 0x194   :  { %v197_v43 = vpop.f32.mrf.mxu2 }
 0x196   :  { %v158_v42 = vpop.f32.mrf.mxu1 }
 0x197   :  { %v165_v63 = vrot.slane %v158_v42, 1 }
 0x199   :  { %v171_v6 = vsel %vm169_vm7, %v164_v55, %v165_v63  ;;  %v364_v55 = vld [vmem:[%s813_s4] sm:$0xff] }
 0x19a   :  { %v198_v12 = vadd.f32 %v197_v43, %v171_v6 }
 0x19c   :  { %v200_v44 = vpop.f32.mrf.mxu3 }
 0x19d   :  { %v706_v48 = vpop.f32.mrf.mxu2 }
 0x19e   :  { %v160_v45 = vpop.f32.mrf.mxu1  ;;  %v339_v19 = vrot.slane %v706_v48, 4 }
 0x19f   :  { %v166_v15 = vrot.slane %v160_v45, 1 }
 0x1a1   :  { %v170_v25 = vsel %vm169_vm7, %v165_v63, %v166_v15  ;;  %v173_v32 = vsel %vm169_vm7, %v166_v15, %v163_v56  ;;  %v548_v56 = vld [vmem:[%s813_s4 + $0x20] sm:$0xff]  ;;  %v366_v63 = vld [vmem:[%s813_s4 + $0x10] sm:$0xff] }
 0x1a2   :  { %v201_v35 = vadd.f32 %v200_v44, %v170_v25  ;;  %v365_v44 = vld [vmem:[%s813_s4 + $0x8] sm:$0xff] }
 0x1a4   :  { %v202_v46 = vpop.f32.mrf.mxu3 }
 0x1a5   :  { %v331_v54 = vpop.f32.mrf.mxu2  ;;  %v203_v36 = vadd.f32 %v202_v46, %v173_v32  ;;  %v549_v46 = vld [vmem:[%s813_s4 + $0x28] sm:$0xff] }
 0x1a6   :  { %v708_v49 = vpop.f32.mrf.mxu1  ;;  %v340_v13 = vrot.slane %v331_v54, 4 }
 0x1a7   :  { %v290_v8 = vrot.slane %v708_v49, 3 }
 0x1a8   :  { %v346_v22 = vsel %vm343_vm10, %v339_v19, %v340_v13 }
 0x1ac   :  { %v710_v50 = vpop.f32.mrf.mxu3 }
 0x1ad   :  { %v241_v62 = vrot.slane %v710_v50, 2  ;;  %v334_v4 = vpop.f32.mrf.mxu2 }
 0x1ae   :  { %v282_v51 = vpop.f32.mrf.mxu1  ;;  %v341_v16 = vrot.slane %v334_v4, 4 }
 0x1af   :  { %v291_v5 = vrot.slane %v282_v51, 3 }
 0x1b0   :  { %v345_v26 = vsel %vm343_vm10, %v340_v13, %v341_v16 }
 0x1b1   :  { %v297_v14 = vsel %vm294_vm9, %v290_v8, %v291_v5 }
 0x1b4   :  { %v233_v57 = vpop.f32.mrf.mxu3 }
 0x1b5   :  { %v242_v58 = vrot.slane %v233_v57, 2  ;;  %v336_v29 = vpop.f32.mrf.mxu2 }
 0x1b6   :  { %v285_v2 = vpop.f32.mrf.mxu1  ;;  %v342_v39 = vrot.slane %v336_v29, 4 }
 0x1b7   :  { %v248_v1 = vsel %vm245_vm8, %v241_v62, %v242_v58  ;;  %v292_v10 = vrot.slane %v285_v2, 3  ;;  %v550_v2 = vld [vmem:[%s813_s4 + $0x30] sm:$0xff] }
 0x1b8   :  { %v250_v7 = vadd.f32 %v248_v1, %v196_v3  ;;  %v344_v53 = vsel %vm343_vm10, %v341_v16, %v342_v39  ;;  %v347_v54 = vsel %vm343_vm10, %v342_v39, %v339_v19  ;;  %v367_v1 = vld [vmem:[%s813_s4 + $0x18] sm:$0xff] }
 0x1b9   :  { %v296_v21 = vsel %vm294_vm9, %v291_v5, %v292_v10  ;;  %v551_v3 = vld [vmem:[%s813_s4 + $0x38] sm:$0xff] }
 0x1ba   :  { %v299_v17 = vadd.f32 %v297_v14, %v250_v7 }
 0x1bc   :  { %v236_v9 = vpop.f32.mrf.mxu3  ;;  %v348_v27 = vadd.f32 %v346_v22, %v299_v17 }
 0x1bd   :  { %v243_v11 = vrot.slane %v236_v9, 2 }
 0x1be   :  { %v287_v24 = vpop.f32.mrf.mxu1  ;;  %v356_v38 = vadd.f32 %v575_v28, %v348_v27 }
 0x1bf   :  { %v247_v18 = vsel %vm245_vm8, %v242_v58, %v243_v11  ;;  %v293_v33 = vrot.slane %v287_v24, 3 }
 0x1c0   :  { %v251_v20 = vadd.f32 %v247_v18, %v198_v12  ;;  %v360_v51 = vmax.f32 %v356_v38, 0.0 }
 0x1c1   :  { %v295_v47 = vsel %vm294_vm9, %v292_v10, %v293_v33  ;;  %v298_v48 = vsel %vm294_vm9, %v293_v33, %v290_v8 }
 0x1c2   :  { %v300_v23 = vadd.f32 %v296_v21, %v251_v20  ;;  %v368_v52 = vmul.f32 %v364_v55, %v360_v51  ;;  %v391_v0 = vmul.f32 %v548_v56, %v360_v51 }
 0x1c4   :  { %v349_v30 = vadd.f32 %v345_v26, %v300_v23  ;;  %v238_v31 = vpop.f32.mrf.mxu3  ;;  %v373_v12 = vsel %vm372_vm11, %v368_v52, -inf  ;;  %v395_v13 = vsel %vm372_vm11, %v391_v0, -inf }
 0x1c5   :  { %v244_v34 = vrot.slane %v238_v31, 2 }
 0x1c6   :  { %v357_v37 = vadd.f32 %v575_v28, %v349_v30 }
 0x1c7   :  { %v246_v40 = vsel %vm245_vm8, %v243_v11, %v244_v34  ;;  %v249_v41 = vsel %vm245_vm8, %v244_v34, %v241_v62 }
 0x1c8   :  { %v252_v42 = vadd.f32 %v246_v40, %v201_v35  ;;  %v253_v43 = vadd.f32 %v249_v41, %v203_v36  ;;  %v361_v45 = vmax.f32 %v357_v37, 0.0  ;;  %v576_v37 = vld [vmem:[%s815_s6] ss:$0 sm:$0xff] }
 0x1ca   :  { %v301_v49 = vadd.f32 %v295_v47, %v252_v42  ;;  %v302_v50 = vadd.f32 %v298_v48, %v253_v43  ;;  %v369_v59 = vmul.f32 %v365_v44, %v361_v45  ;;  %v392_v60 = vmul.f32 %v549_v46, %v361_v45 }
 0x1cc   :  { %v350_v57 = vadd.f32 %v344_v53, %v301_v49  ;;  %v351_v58 = vadd.f32 %v347_v54, %v302_v50  ;;  %v374_v6 = vsel %vm372_vm11, %v369_v59, -inf  ;;  %v396_v7 = vsel %vm372_vm11, %v392_v60, -inf }
 0x1cd   :  { %v377_v18 = vmax.f32 %v373_v12, %v374_v6  ;;  %v399_v19 = vmax.f32 %v395_v13, %v396_v7 }
 0x1ce   :  { %v358_v61 = vadd.f32 %v575_v28, %v350_v57  ;;  %v359_v62 = vadd.f32 %v575_v28, %v351_v58 }
 0x1d0   :  { %v362_v4 = vmax.f32 %v358_v61, 0.0  ;;  %v363_v5 = vmax.f32 %v359_v62, 0.0 }
 0x1d2   :  { %v370_v8 = vmul.f32 %v366_v63, %v362_v4  ;;  %v371_v9 = vmul.f32 %v367_v1, %v363_v5  ;;  %v393_v10 = vmul.f32 %v550_v2, %v362_v4  ;;  %v394_v11 = vmul.f32 %v551_v3, %v363_v5 }
 0x1d4   :  { %v375_v14 = vsel %vm372_vm11, %v370_v8, -inf  ;;  %v376_v15 = vsel %vm372_vm11, %v371_v9, -inf  ;;  %v397_v16 = vsel %vm372_vm11, %v393_v10, -inf  ;;  %v398_v17 = vsel %vm372_vm11, %v394_v11, -inf }
 0x1d5   :  { %v378_v20 = vmax.f32 %v375_v14, %v376_v15  ;;  %v400_v21 = vmax.f32 %v397_v16, %v398_v17 }
 0x1d7   :  { %v379_v22 = vmax.f32 %v377_v18, %v378_v20  ;;  %v401_v23 = vmax.f32 %v399_v19, %v400_v21 }
 0x1d9   :  { %v380_v24 = vrot.slane %v379_v22, 4  ;;  %v402_v25 = vrot.slane %v401_v23, 4 }
 0x1db   :  { %v381_v26 = vmax.f32 %v379_v22, %v380_v24  ;;  %v403_v27 = vmax.f32 %v401_v23, %v402_v25 }
 0x1dd   :  { %v382_v28 = vrot.slane %v381_v26, 2  ;;  %v404_v29 = vrot.slane %v403_v27, 2 }
 0x1df   :  { %v383_v30 = vmax.f32 %v381_v26, %v382_v28  ;;  %v405_v31 = vmax.f32 %v403_v27, %v404_v29 }
 0x1e1   :  { %v384_v32 = vrot.slane %v383_v30, 1  ;;  %v406_v33 = vrot.slane %v405_v31, 1 }
 0x1e3   :  { %v385_v34 = vmax.f32 %v383_v30, %v384_v32  ;;  %v407_v35 = vmax.f32 %v405_v31, %v406_v33 }
 0x1e5   :  { %v408_v36 = vsel %vm91_vm0, %v385_v34, %v407_v35 }
 0x1e6   :  { %552 = vmatmul.msk.f32.vlgmr.msra.gmra.mxu3 %vm372_vm11, %v408_v36 }
 0x269   :  { %v436_v38 = vpop.f32.mrf.mxu3 }
 0x26a   :  { %v437_v39 = vadd.f32 %v576_v37, %v436_v38 }
 0x26c   :  { %v440_v40 = vsel %vm439_vm12, %v437_v39, -inf }
 0x26d   :  { %441 = vmax.xlane.f32.xlu2 %v440_v40 }
 0x2e0   :  { %v442_v41 = vpop.xlane.xlu2 %441 }
 0x2e1   :  { %v443_v42 = vsub.f32 %v437_v39, %v442_v41 }
 0x2e3   :  { %v444_v43 = vmul.f32 1.442695, %v443_v42 }
 0x2e5   :  { %577 = vpow2.f32 %v444_v43 }
 0x2eb   :  { %v578_v45 = vpop.eup %577 }
 0x2ec   :  { %v446_v47 = vsel %vm439_vm12, %v578_v45, 0.0 }
 0x2ed   :  { %447 = vadd.xlane.f32.xlu2 %v446_v47 }
 0x360   :  { %v448_v48 = vpop.xlane.xlu2 %447 }
 0x361   :  { %579 = vrcp.f32 %v448_v48 }
 0x367   :  { %v580_v44 = vpop.eup %579 }
 0x368   :  { %v450_v46 = vmul.f32 %v580_v44, %v578_v45 }
 0x36a   :  { %451 = vst.msk [vmem:[#allocation2] sm:$0x3] %vm439_vm12, %v450_v46 }
 0x36b   :  { %462 = dma.vmem_to_hbm [thread:$0]  %s458_s10, 32, %s460_s2, [#allocation3]  }
 0x36c   :  { %605 = dma.done.wait [#allocation3], 32  }
 0x36d   :  { %606 = vsyncadd [#allocation3], 4294967264 }
 0x36e   :  { %467 = vsyncpa [#allocation3], 1 }

</bundles_post_ra>
